<compile_context>
chip_gen: v7x
topology: tpu7x:2x2x1
jax: 0.10.0
libtpu: 0.0.40
codegen_flags: <defaults>
</compile_context>

<pallas_src>
import math

import jax
import jax.numpy as jnp
from jax.experimental import pallas as pl
from jax.experimental.pallas import tpu as pltpu


def _round_up(x, m):
    return ((x + m - 1) // m) * m


def _make_mlp_kernel(num_layers, sigmoid_output, matmul_dtype):
    """Kernel factory. Ref layout: (x, w1, b1, ..., wL, bL, out)."""

    def kernel(x_ref, *refs):
        o_ref = refs[-1]
        h = x_ref[...].astype(jnp.float32)                 # (bm, d_in)
        for i in range(num_layers):
            w = refs[2 * i][...]                           # (d_prev, d_next), matmul_dtype
            b = refs[2 * i + 1][...]                       # (1, d_next), f32
            h = jnp.dot(h.astype(matmul_dtype), w,
                        preferred_element_type=jnp.float32) + b
            if i < num_layers - 1:                         # ReLU on all but last layer
                h = jnp.maximum(h, 0.0)
        if sigmoid_output:
            h = jax.nn.sigmoid(h)
        o_ref[...] = h.astype(o_ref.dtype)                 # single lane-dense store

    return kernel


def mlp_forward(x, weights, biases, *, sigmoid_output=False, block_m=128,
                matmul_dtype=jnp.bfloat16, pad_output_lanes=True):
    """Fused MLP forward.

    weights[i]: (d_in_i, d_out_i)  (transposed vs PyTorch's (out, in) layout)
    biases[i] : (d_out_i,)
    x         : (..., d_in_0)
    """
    num_layers = len(weights)
    assert num_layers >= 1 and len(biases) == num_layers

    *lead, d_in = x.shape
    m = math.prod(lead) if lead else 1
    x2 = x.reshape(m, d_in)

    # Row tiling: multiple of 8 sublanes, capped at block_m.
    bm = min(block_m, _round_up(m, 8))
    m_pad = _round_up(m, bm)
    if m_pad != m:
        x2 = jnp.pad(x2, ((0, m_pad - m), (0, 0)))

    # bf16 weights (half the DMA'd/VMEM-resident bytes); biases stay f32.
    ws = [w.astype(matmul_dtype) for w in weights]
    bs = [b.reshape(1, -1).astype(jnp.float32) for b in biases]

    # Lane-dense output: pad the final output dim to a multiple of 128 with
    # zero columns (sliced off below — exact, since the extra columns never
    # feed anything).
    d_out = weights[-1].shape[-1]
    d_out_pad = _round_up(d_out, 128) if pad_output_lanes else d_out
    if d_out_pad != d_out:
        ws[-1] = jnp.pad(ws[-1], ((0, 0), (0, d_out_pad - d_out)))
        bs[-1] = jnp.pad(bs[-1], ((0, 0), (0, d_out_pad - d_out)))
    # TODO(synk): input loads stay masked when d_in < 128; padding d_in here is
    # not worth the extra wrapper op at these sizes.

    in_specs = [pl.BlockSpec((bm, d_in), lambda i: (i, 0))]
    operands = [x2]
    for w, b in zip(ws, bs):
        in_specs.append(pl.BlockSpec(w.shape, lambda i: (0, 0)))   # resident weights
        in_specs.append(pl.BlockSpec(b.shape, lambda i: (0, 0)))
        operands.extend([w, b])

    out = pl.pallas_call(
        _make_mlp_kernel(num_layers, sigmoid_output, matmul_dtype),
        out_shape=jax.ShapeDtypeStruct((m_pad, d_out_pad), x.dtype),
        grid=(m_pad // bm,),
        in_specs=in_specs,
        out_specs=pl.BlockSpec((bm, d_out_pad), lambda i: (i, 0)),
        compiler_params=pltpu.CompilerParams(
            dimension_semantics=("parallel",)),
    )(*operands)

    return out[:m, :d_out].reshape(*lead, d_out)


def mlp_reference(x, weights, biases, *, sigmoid_output=False, matmul_dtype=None):
    """Pure-JAX reference of the PyTorch MLP forward.

    matmul_dtype=None        -> full-f32 matmuls (HIGHEST precision).
    matmul_dtype=jnp.bfloat16 -> mirrors the kernel's declared numerics
                                 (bf16 operands, f32 accumulation).
    """
    h = x.astype(jnp.float32)
    n = len(weights)
    for i, (w, b) in enumerate(zip(weights, biases)):
        if matmul_dtype is None:
            h = jnp.dot(h, w, precision=jax.lax.Precision.HIGHEST) + b
        else:
            h = jnp.dot(h.astype(matmul_dtype), w.astype(matmul_dtype),
                        preferred_element_type=jnp.float32) + b
        if i < n - 1:
            h = jnp.maximum(h, 0.0)
    if sigmoid_output:
        h = jax.nn.sigmoid(h)
    return h


if __name__ == "__main__":
    key = jax.random.PRNGKey(0)

    def make_mlp_params(key, dims):
        ws, bs = [], []
        for n_in, n_out in zip(dims[:-1], dims[1:]):
            key, kw, kb = jax.random.split(key, 3)
            bound = 1.0 / (n_in ** 0.5)     # PyTorch nn.Linear default init range
            ws.append(jax.random.uniform(kw, (n_in, n_out), jnp.float32, -bound, bound))
            bs.append(jax.random.uniform(kb, (n_out,), jnp.float32, -bound, bound))
        return key, ws, bs

    # (name, x_shape, layer dims [input, hidden..., output], sigmoid_output, block_m)
    configs = [
        ("mlp3",        (2, 8, 16),  [16, 32, 32, 8], False, 128),  # 3 layers, SAM-style head
        ("mlp2_sig",    (2, 80, 32), [32, 32, 32],    True,  32),   # multi-block grid + sigmoid
        ("mlp1_ragged", (3, 5, 8),   [8, 16],         False, 128),  # 1 layer, ragged row count
    ]

    ok = True
    for name, x_shape, dims, sig, bm in configs:
        key, kx = jax.random.split(key)
        x = jax.random.normal(kx, x_shape, jnp.float32)
        key, ws, bs = make_mlp_params(key, dims)

        out = mlp_forward(x, ws, bs, sigmoid_output=sig, block_m=bm)
        out = jax.block_until_ready(out)

        # Tight check vs. a reference with identical bf16-operand numerics.
        ref_bf16 = mlp_reference(x, ws, bs, sigmoid_output=sig,
                                 matmul_dtype=jnp.bfloat16)
        err_tight = float(jnp.max(jnp.abs(out - ref_bf16)))

        # Sanity check vs. the full-f32 module semantics (bf16 rounding budget).
        ref_f32 = mlp_reference(x, ws, bs, sigmoid_output=sig)
        err_f32 = float(jnp.max(jnp.abs(out - ref_f32)))

        if err_tight > 1e-4 or err_f32 > 5e-2:
            ok = False
            print(f"[{name}] FAILED: err_vs_bf16_ref={err_tight:.3e} "
                  f"err_vs_f32_ref={err_f32:.3e}")

    if not ok:
        raise AssertionError("kernel/reference mismatch")
    print("KERNEL_OK")
</pallas_src>

<mosaic_0001>
module attributes {stable_mosaic.version = 11 : i64} {
  func.func @kernel(%arg0: i32, %arg1: memref<16x16xf32, #tpu.memory_space<vmem>>, %arg2: memref<16x32xbf16, #tpu.memory_space<vmem>>, %arg3: memref<1x32xf32, #tpu.memory_space<vmem>>, %arg4: memref<32x32xbf16, #tpu.memory_space<vmem>>, %arg5: memref<1x32xf32, #tpu.memory_space<vmem>>, %arg6: memref<32x128xbf16, #tpu.memory_space<vmem>>, %arg7: memref<1x128xf32, #tpu.memory_space<vmem>>, %arg8: memref<16x128xf32, #tpu.memory_space<vmem>>) attributes {dimension_semantics = [#tpu.dimension_semantics<parallel>], iteration_bounds = array<i64: 1>, scalar_prefetch = 0 : i64, scratch_operands = 0 : i64, tpu.core_type = #tpu.core_type<tc>, window_params = [{transform_indices = @transform_0, window_bounds = array<i64: 16, 16>}, {pipeline_mode = #tpu.pipeline_mode<synchronous>, transform_indices = @transform_1, window_bounds = array<i64: 16, 32>}, {pipeline_mode = #tpu.pipeline_mode<synchronous>, transform_indices = @transform_2, window_bounds = array<i64: 1, 32>}, {pipeline_mode = #tpu.pipeline_mode<synchronous>, transform_indices = @transform_3, window_bounds = array<i64: 32, 32>}, {pipeline_mode = #tpu.pipeline_mode<synchronous>, transform_indices = @transform_4, window_bounds = array<i64: 1, 32>}, {pipeline_mode = #tpu.pipeline_mode<synchronous>, transform_indices = @transform_5, window_bounds = array<i64: 32, 128>}, {pipeline_mode = #tpu.pipeline_mode<synchronous>, transform_indices = @transform_6, window_bounds = array<i64: 1, 128>}, {transform_indices = @transform_7, window_bounds = array<i64: 16, 128>}]} {
    %c0 = arith.constant 0 : index
    %c0_0 = arith.constant 0 : index
    %0 = vector.load %arg1[%c0, %c0_0] : memref<16x16xf32, #tpu.memory_space<vmem>>, vector<16x16xf32>
    %c0_1 = arith.constant 0 : index
    %c0_2 = arith.constant 0 : index
    %1 = vector.load %arg2[%c0_1, %c0_2] : memref<16x32xbf16, #tpu.memory_space<vmem>>, vector<16x32xbf16>
    %c0_3 = arith.constant 0 : index
    %c0_4 = arith.constant 0 : index
    %2 = vector.load %arg3[%c0_3, %c0_4] : memref<1x32xf32, #tpu.memory_space<vmem>>, vector<1x32xf32>
    %3 = arith.truncf %0 : vector<16x16xf32> to vector<16x16xbf16>
    %cst = arith.constant dense<0.000000e+00> : vector<16x32xf32>
    %4 = tpu.matmul %3, %1, %cst {dimension_numbers = #tpu.dot_dimension_numbers<[1], [0], [0], [1], [0, 0, 1, 1], [], []>} : vector<16x16xbf16>, vector<16x32xbf16>, vector<16x32xf32> -> vector<16x32xf32>
    %5 = vector.broadcast %2 : vector<1x32xf32> to vector<16x32xf32>
    %6 = arith.addf %4, %5 : vector<16x32xf32>
    %cst_5 = arith.constant 0.000000e+00 : f32
    %7 = vector.broadcast %cst_5 : f32 to vector<16x32xf32>
    %8 = arith.maximumf %6, %7 : vector<16x32xf32>
    %c0_6 = arith.constant 0 : index
    %c0_7 = arith.constant 0 : index
    %9 = vector.load %arg4[%c0_6, %c0_7] : memref<32x32xbf16, #tpu.memory_space<vmem>>, vector<32x32xbf16>
    %c0_8 = arith.constant 0 : index
    %c0_9 = arith.constant 0 : index
    %10 = vector.load %arg5[%c0_8, %c0_9] : memref<1x32xf32, #tpu.memory_space<vmem>>, vector<1x32xf32>
    %11 = arith.truncf %8 : vector<16x32xf32> to vector<16x32xbf16>
    %cst_10 = arith.constant dense<0.000000e+00> : vector<16x32xf32>
    %12 = tpu.matmul %11, %9, %cst_10 {dimension_numbers = #tpu.dot_dimension_numbers<[1], [0], [0], [1], [0, 0, 1, 1], [], []>} : vector<16x32xbf16>, vector<32x32xbf16>, vector<16x32xf32> -> vector<16x32xf32>
    %13 = vector.broadcast %10 : vector<1x32xf32> to vector<16x32xf32>
    %14 = arith.addf %12, %13 : vector<16x32xf32>
    %cst_11 = arith.constant 0.000000e+00 : f32
    %15 = vector.broadcast %cst_11 : f32 to vector<16x32xf32>
    %16 = arith.maximumf %14, %15 : vector<16x32xf32>
    %c0_12 = arith.constant 0 : index
    %c0_13 = arith.constant 0 : index
    %17 = vector.load %arg6[%c0_12, %c0_13] : memref<32x128xbf16, #tpu.memory_space<vmem>>, vector<32x128xbf16>
    %c0_14 = arith.constant 0 : index
    %c0_15 = arith.constant 0 : index
    %18 = vector.load %arg7[%c0_14, %c0_15] : memref<1x128xf32, #tpu.memory_space<vmem>>, vector<1x128xf32>
    %19 = arith.truncf %16 : vector<16x32xf32> to vector<16x32xbf16>
    %cst_16 = arith.constant dense<0.000000e+00> : vector<16x128xf32>
    %20 = tpu.matmul %19, %17, %cst_16 {dimension_numbers = #tpu.dot_dimension_numbers<[1], [0], [0], [1], [0, 0, 1, 1], [], []>} : vector<16x32xbf16>, vector<32x128xbf16>, vector<16x128xf32> -> vector<16x128xf32>
    %21 = vector.broadcast %18 : vector<1x128xf32> to vector<16x128xf32>
    %22 = arith.addf %20, %21 : vector<16x128xf32>
    %c0_17 = arith.constant 0 : index
    %c0_18 = arith.constant 0 : index
    %23 = vector.load %arg8[%c0_17, %c0_18] : memref<16x128xf32, #tpu.memory_space<vmem>>, vector<16x128xf32>
    tpu.vector_store %arg8[%c0_17, %c0_18], %22 {strides = array<i32>} : memref<16x128xf32, #tpu.memory_space<vmem>>, vector<16x128xf32>,
    return
  }
  func.func @transform_0(%arg0: i32) -> (i32, i32) {
    %c0_i32 = arith.constant 0 : i32
    %c0_i32_0 = arith.constant 0 : i32
    return %arg0, %c0_i32 : i32, i32
  }
  func.func @transform_1(%arg0: i32) -> (i32, i32) {
    %c0_i32 = arith.constant 0 : i32
    %c0_i32_0 = arith.constant 0 : i32
    %c0_i32_1 = arith.constant 0 : i32
    return %c0_i32, %c0_i32_0 : i32, i32
  }
  func.func @transform_2(%arg0: i32) -> (i32, i32) {
    %c0_i32 = arith.constant 0 : i32
    %c0_i32_0 = arith.constant 0 : i32
    %c0_i32_1 = arith.constant 0 : i32
    return %c0_i32, %c0_i32_0 : i32, i32
  }
  func.func @transform_3(%arg0: i32) -> (i32, i32) {
    %c0_i32 = arith.constant 0 : i32
    %c0_i32_0 = arith.constant 0 : i32
    %c0_i32_1 = arith.constant 0 : i32
    return %c0_i32, %c0_i32_0 : i32, i32
  }
  func.func @transform_4(%arg0: i32) -> (i32, i32) {
    %c0_i32 = arith.constant 0 : i32
    %c0_i32_0 = arith.constant 0 : i32
    %c0_i32_1 = arith.constant 0 : i32
    return %c0_i32, %c0_i32_0 : i32, i32
  }
  func.func @transform_5(%arg0: i32) -> (i32, i32) {
    %c0_i32 = arith.constant 0 : i32
    %c0_i32_0 = arith.constant 0 : i32
    %c0_i32_1 = arith.constant 0 : i32
    return %c0_i32, %c0_i32_0 : i32, i32
  }
  func.func @transform_6(%arg0: i32) -> (i32, i32) {
    %c0_i32 = arith.constant 0 : i32
    %c0_i32_0 = arith.constant 0 : i32
    %c0_i32_1 = arith.constant 0 : i32
    return %c0_i32, %c0_i32_0 : i32, i32
  }
  func.func @transform_7(%arg0: i32) -> (i32, i32) {
    %c0_i32 = arith.constant 0 : i32
    %c0_i32_0 = arith.constant 0 : i32
    return %arg0, %c0_i32 : i32, i32
  }
}

</mosaic_0001>

<bundles_post_ra>
// kernel: tpu_custom_call.1
= control target key start
LH: loop header
LB: loop body
LE: loop exit
PB: predicated region body
PF: predicated region fallthrough
CT: control target
= control target key end

     0   :  { %12 = vsyncpa [#allocation3], 0  ;;  %s570_s0 = inlined_call_operand.hbm [shape: f32[16,16], index: 0, kind: input, shape index: {}]   ;;  %s571_s1 = inlined_call_operand.hbm [shape: bf16[16,32], index: 1, kind: input, shape index: {}]   ;;  %s572_s2 = inlined_call_operand.vmem [shape: f32[1,32], index: 2, kind: input, shape index: {}]   ;;  %s573_s3 = inlined_call_operand.hbm [shape: bf16[32,32], index: 3, kind: input, shape index: {}]   ;;  %s574_s4 = inlined_call_operand.vmem [shape: f32[1,32], index: 4, kind: input, shape index: {}]   ;;  %s575_s5 = inlined_call_operand.vmem [shape: bf16[32,128], index: 5, kind: input, shape index: {}]   ;;  %s576_s6 = inlined_call_operand.vmem [shape: f32[1,128], index: 6, kind: input, shape index: {}]   ;;  %s577_s7 = inlined_call_operand.hbm [shape: f32[16,128], index: 7, kind: output, shape index: {}]  }
   0x1   :  { %13 = vsyncpa [#allocation6], 0 }
   0x2   :  { %14 = vsyncpa [#allocation4], 0  ;;  %s443_s24 = smov [#allocation5]   ;;  %s349_s28 = scalar_lea.hbm %s571_s1, 128 }
   0x3   :  { %s32_s25 = sshll.u32 %s443_s24, 4  ;;  %p350_p0 = scmp.ne.s32.totalorder %s571_s1, %s349_s28  ;;  %s33_s25 = int_to_ptr.vmem [resolvable:$true] %s32_s25 }
   0x4   :  { %p353_p1 = scmp.lt.u32.totalorder %s349_s28, %s571_s1 }
   0x6   :  { %p355_p2 = pnand %p353_p1, %p350_p0 }
   0x8   :  { %358 = shalt.err (!%p355_p2)
}
   0x9   :  { %s359_s10 = scalar_lea.vmem %s33_s25, 128  ;;  %p364_p4 = scmp.lt.s32.totalorder %s33_s25, %s33_s25 }
   0xa   :  { %p360_p3 = scmp.ne.s32.totalorder %s33_s25, %s359_s10  ;;  %p365_p5 = scmp.lt.s32.totalorder %s359_s10, %s359_s10 }
   0xc   :  { %p366_p6 = por %p365_p5, %p364_p4 }
   0xe   :  { %p367_p7 = pnand %p366_p6, %p360_p3 }
  0x10   :  { %370 = shalt.err (!%p367_p7)
}
  0x11   :  { %s444_s11 = smov 64   ;;  %s445_s12 = smov 4  }
  0x12   :  { %38 = dma.hbm_to_vmem [thread:$0]  %s571_s1, 128, %s33_s25, [#allocation6], %s444_s11, %s444_s11, %s445_s12  }
  0x13   :  { %s446_s15 = smov [#allocation2]   ;;  %s371_s19 = scalar_lea.hbm %s570_s0, 256 }
  0x14   :  { %s20_s16 = sshll.u32 %s446_s15, 4  ;;  %p372_p8 = scmp.ne.s32.totalorder %s570_s0, %s371_s19  ;;  %s21_s16 = int_to_ptr.vmem [resolvable:$true] %s20_s16 }
  0x15   :  { %p375_p9 = scmp.lt.u32.totalorder %s371_s19, %s570_s0 }
  0x17   :  { %p377_p10 = pnand %p375_p9, %p372_p8 }
  0x19   :  { %380 = shalt.err (!%p377_p10)
}
  0x1a   :  { %s381_s24 = scalar_lea.vmem %s21_s16, 256  ;;  %p386_p12 = scmp.lt.s32.totalorder %s21_s16, %s21_s16 }
  0x1b   :  { %p382_p11 = scmp.ne.s32.totalorder %s21_s16, %s381_s24  ;;  %p387_p13 = scmp.lt.s32.totalorder %s381_s24, %s381_s24 }
  0x1d   :  { %p388_p0 = por %p387_p13, %p386_p12 }
  0x1f   :  { %p389_p1 = pnand %p388_p0, %p382_p11 }
  0x21   :  { %392 = shalt.err (!%p389_p1)
}
  0x22   :  { %s447_s1 = smov 128   ;;  %s448_s25 = smov 8  }
  0x23   :  { %26 = dma.hbm_to_vmem [thread:$0]  %s570_s0, 256, %s21_s16, [#allocation3], %s447_s1, %s447_s1, %s448_s25  }
  0x24   :  { %s449_s28 = smov [#allocation7]   ;;  %s393_s9 = scalar_lea.hbm %s573_s3, 256 }
  0x25   :  { %s46_s29 = sshll.u32 %s449_s28, 4  ;;  %p394_p2 = scmp.ne.s32.totalorder %s573_s3, %s393_s9  ;;  %s47_s29 = int_to_ptr.vmem [resolvable:$true] %s46_s29 }
  0x26   :  { %p397_p3 = scmp.lt.u32.totalorder %s393_s9, %s573_s3 }
  0x28   :  { %p399_p4 = pnand %p397_p3, %p394_p2 }
  0x2a   :  { %402 = shalt.err (!%p399_p4)
}
  0x2b   :  { %s403_s17 = scalar_lea.vmem %s47_s29, 256  ;;  %p408_p6 = scmp.lt.s32.totalorder %s47_s29, %s47_s29 }
  0x2c   :  { %p404_p5 = scmp.ne.s32.totalorder %s47_s29, %s403_s17  ;;  %p409_p7 = scmp.lt.s32.totalorder %s403_s17, %s403_s17 }
  0x2e   :  { %p410_p8 = por %p409_p7, %p408_p6 }
  0x30   :  { %p411_p9 = pnand %p410_p8, %p404_p5 }
  0x32   :  { %414 = shalt.err (!%p411_p9)
}
  0x33   :  { %52 = dma.hbm_to_vmem [thread:$0]  %s573_s3, 256, %s47_s29, [#allocation6], %s444_s11, %s444_s11, %s445_s12  }
  0x34   :  { %437 = dma.done.wait [#allocation3], 256  }
  0x35   :  { %438 = vsyncadd [#allocation3], 4294967040 }
  0x36   :  { %439 = dma.done.wait [#allocation6], 384  }
  0x37   :  { %440 = vsyncadd [#allocation6], 4294966912  ;;  %v450_v0 = vmov 0.0   ;;  %vm451_vm0 = vmmov 0   ;;  %v344_v1 = vld [vmem:[#allocation5] sm:$0xff]   ;;  %v69_v2 = vld [vmem:[#allocation2] sm:$0xff] }
  0x38   :  { %312 = vmatprep.subr.bf16.mxu0 %v450_v0  ;;  %314 = vmatprep.mubr.msk.bf16.mxu0 %vm451_vm0, %v450_v0  ;;  %v70_v3 = vld [vmem:[#allocation2 + $0x8] sm:$0xff]  ;;  %vm87_vm1 = vcmask 130048   ;;  %v345_v5 = vld [vmem:[#allocation7] sm:$0xff]   ;;  %v346_v6 = vld [vmem:[#allocation7 + $0x8] sm:$0xff]   ;;  %vm158_vm2 = vcmask 261120  }
  0x39   :  { %318 = vmatprep.subr.bf16.mxu1 %v450_v0  ;;  %322 = vmatprep.mubr.msk.bf16.mxu1 %vm451_vm0, %v450_v0  ;;  %v74_v4 = vpack.c.bf16 %v70_v3, %v69_v2  ;;  %v293_v7 = vld [vmem:[%s572_s2] ss:$0 sm:$0xff]  ;;  %v348_v18 = vld [vmem:[%s575_s5 + $0x8] sm:$0xff]  }
  0x3a   :  { %313 = vmatpush3.bf16.msra.mxu0 %v344_v1  ;;  %319 = vmatpush3.bf16.msra.mxu1 %v345_v5  ;;  %v347_v17 = vld [vmem:[%s575_s5] sm:$0xff]   ;;  %s452_s5 = smov [#allocation8]  }
  0x3b   :  { %326 = vmatprep.subr.bf16.mxu0 %v450_v0  ;;  %320 = vmatprep.subr.bf16.mxu1 %v450_v0  ;;  %v296_v19 = vld [vmem:[%s574_s4] ss:$0 sm:$0xff]  ;;  %s280_s24 = sshll.u32 %s452_s5, 4  ;;  %s281_s24 = int_to_ptr.vmem [resolvable:$true] %s280_s24 }
  0x3c   :  { %v300_v29 = vld [vmem:[%s576_s6] ss:$0 sm:$0xff]  ;;  %s415_s4 = scalar_lea.vmem %s281_s24, 256  ;;  %p420_p11 = scmp.lt.s32.totalorder %s281_s24, %s281_s24 }
  0x3d   :  { %315 = vmatmul.mubr.msk.bf16.vlgmr.msra.gmra.mrb[0].mxu0 %vm87_vm1, %v74_v4  ;;  %p416_p10 = scmp.ne.s32.totalorder %s281_s24, %s415_s4  ;;  %p421_p12 = scmp.lt.s32.totalorder %s415_s4, %s415_s4 }
  0x3e   :  { %330 = vmatprep.mubr.msk.bf16.mxu0 %vm451_vm0, %v450_v0  ;;  %321 = vmatpush3.bf16.msra.mxu1 %v346_v6 }
  0x3f   :  { %327 = vmatpush3.bf16.msra.mxu0 %v347_v17  ;;  %p422_p13 = por %p421_p12, %p420_p11 }
  0x40   :  { %328 = vmatprep.subr.bf16.mxu0 %v450_v0 }
  0x41   :  { %p423_p0 = pnand %p422_p13, %p416_p10 }
  0x43   :  { %329 = vmatpush3.bf16.msra.mxu0 %v348_v18 }
 0x110   :  { %v125_v8 = vpop.f32.mrb[0].mxu0 }
 0x111   :  { %v126_v9 = vadd.f32 %v293_v7, %v125_v8  ;;  %v316_v10 = vpop.f32.mrb[1].mxu0 }
 0x112   :  { %v128_v11 = vpop.f32.mrb[2].mxu0 }
 0x113   :  { %v129_v12 = vadd.f32 %v293_v7, %v128_v11  ;;  %v317_v13 = vpop.f32.mrb[3].mxu0  ;;  %v132_v14 = vmax.f32 %v126_v9, 0.0 }
 0x115   :  { %v133_v15 = vmax.f32 %v129_v12, 0.0 }
 0x117   :  { %v139_v16 = vpack.c.bf16 %v133_v15, %v132_v14 }
 0x119   :  { %323 = vmatmul.mubr.msk.bf16.vlgmr.msra.gmra.mrb[0].mxu1 %vm158_vm2, %v139_v16 }
 0x1ec   :  { %v196_v20 = vpop.f32.mrb[0].mxu1 }
 0x1ed   :  { %v197_v21 = vadd.f32 %v296_v19, %v196_v20  ;;  %v324_v22 = vpop.f32.mrb[1].mxu1 }
 0x1ee   :  { %v199_v23 = vpop.f32.mrb[2].mxu1 }
 0x1ef   :  { %v200_v24 = vadd.f32 %v296_v19, %v199_v23  ;;  %v325_v25 = vpop.f32.mrb[3].mxu1  ;;  %v203_v26 = vmax.f32 %v197_v21, 0.0 }
 0x1f1   :  { %v204_v27 = vmax.f32 %v200_v24, 0.0 }
 0x1f3   :  { %v210_v28 = vpack.c.bf16 %v204_v27, %v203_v26 }
 0x1f5   :  { %331 = vmatmul.mubr.msk.bf16.vlgmr.msra.gmra.mrb[4].mxu0 %vm158_vm2, %v210_v28 }
 0x2c8   :  { %v266_v30 = vpop.f32.mrb[4].mxu0 }
 0x2c9   :  { %v267_v31 = vadd.f32 %v300_v29, %v266_v30  ;;  %v332_v32 = vpop.f32.mrb[5].mxu0 }
 0x2ca   :  { %v269_v33 = vpop.f32.mrb[6].mxu0 }
 0x2cb   :  { %273 = vst [vmem:[#allocation8] sm:$0xff] %v267_v31  ;;  %v270_v34 = vadd.f32 %v300_v29, %v269_v33  ;;  %v333_v35 = vpop.f32.mrb[7].mxu0 }
 0x2cd   :  { %274 = vst [vmem:[#allocation8 + $0x8] sm:$0xff] %v270_v34 }
 0x2ce   :  { %426 = shalt.err (!%p423_p0)
}
 0x2cf   :  { %s427_s27 = scalar_lea.hbm %s577_s7, 256 }
 0x2d0   :  { %p428_p1 = scmp.ne.s32.totalorder %s577_s7, %s427_s27  ;;  %p431_p2 = scmp.lt.u32.totalorder %s427_s27, %s577_s7 }
 0x2d2   :  { %p433_p3 = pnand %p431_p2, %p428_p1 }
 0x2d4   :  { %436 = shalt.err (!%p433_p3)
}
 0x2d5   :  { %286 = dma.vmem_to_hbm [thread:$0]  %s281_s24, 256, %s577_s7, [#allocation4], %s447_s1, %s447_s1, %s448_s25  }
 0x2d6   :  { %441 = dma.done.wait [#allocation4], 256  }
 0x2d7   :  { %442 = vsyncadd [#allocation4], 4294967040 }
 0x2d8   :  { %290 = vsyncpa [#allocation3], 1 }
 0x2d9   :  { %291 = vsyncpa [#allocation6], 1 }
 0x2da   :  { %292 = vsyncpa [#allocation4], 1 }

</bundles_post_ra>
